<compile_context>
chip_gen: v6e
topology: v6e:2x2x1
jax: 0.10.0
libtpu: 0.0.40
codegen_flags: <defaults>
</compile_context>

<pallas_src>
import functools

import jax
import jax.numpy as jnp
from jax.experimental import pallas as pl
from jax.experimental.pallas import tpu as pltpu

TEMPERATURE = 0.07
EPS = 1e-8       # matches F.cosine_similarity eps (per-norm clamp)
_MIB = 1024 * 1024


def _infonce_kernel(lab_row_ref, lab_col_ref, inv_na_ref, inv_nb_ref, col_bias_ref,
                    fa_ref, fb_ref,
                    cos_ref, row_loss_ref, num_acc, den_acc,
                    *, inv_temperature, use_col_bias):
    j = pl.program_id(1)

    @pl.when(j == 0)
    def _init():
        num_acc[...] = jnp.zeros_like(num_acc)
        den_acc[...] = jnp.zeros_like(den_acc)

    # Raw dot products on the MXU in the features' native dtype, f32 accumulation.
    dots = jax.lax.dot_general(fa_ref[...], fb_ref[...], (((1,), (1,)), ((), ())),
                               preferred_element_type=jnp.float32)        # (TM, TN)

    inv_na = inv_na_ref[...]            # (TM, 1) f32, precomputed in wrapper
    inv_nb = inv_nb_ref[...]            # (1, TN) f32, precomputed in wrapper

    scaled = dots * inv_na              # row-normalised dots, reused below
    cos = scaled * inv_nb               # cosine scores
    cos_ref[...] = cos.astype(cos_ref.dtype)

    # 1/temperature folded into the tiny (1, TN) column scale -> exp argument in
    # one full-tile multiply.  (bf16 exp on v6e/v7x would be faster but carries
    # ~0.4% per-term error at exp(1/0.07); kept exact f32.)
    e_arg = scaled * (inv_nb * inv_temperature)
    if use_col_bias:
        e_arg = e_arg + col_bias_ref[...]   # -1e30 on padded key columns -> exp == 0
    e = jnp.exp(e_arg)                      # f32 EUP; cos in [-1,1] so e <= ~1.6e6

    same = lab_row_ref[...] == lab_col_ref[...]                           # (TM, TN)
    # numerator reduce on the XLU; denominator via a ones mat-vec on the otherwise
    # idle MXU so the two cross-lane reductions overlap.
    num_acc[...] += jnp.sum(jnp.where(same, e, 0.0), axis=1, keepdims=True)
    ones_col = jnp.ones((e.shape[1], 1), jnp.float32)
    den_acc[...] += jax.lax.dot_general(e, ones_col, (((1,), (0,)), ((), ())),
                                        preferred_element_type=jnp.float32)

    @pl.when(j == pl.num_programs(1) - 1)
    def _finalize():
        num = num_acc[...]
        den = den_acc[...]
        # "if numerator == 0: numerator = 1" -- applied only after ALL key tiles.
        num = jnp.where(num == 0.0, jnp.float32(1.0), num)
        row_loss_ref[...] = jnp.log(den) - jnp.log(num)     # == -log(num/den)


def _round_up(x, m):
    return ((x + m - 1) // m) * m


def _pick_tile(n, target, align):
    """Largest multiple of `align` that divides n and is <= target, else n (full)."""
    if n <= target or n % align != 0:
        return n
    t = (min(target, n) // align) * align
    while t >= align:
        if n % t == 0:
            return t
        t -= align
    return n


def _vmem_capacity_bytes():
    try:
        info = pltpu.get_tpu_info()
        cap = getattr(info, "vmem_capacity_bytes", None)
        if cap:
            return int(cap)
    except Exception:
        pass
    return 64 * _MIB    # conservative (v7x-safe) fallback


def infonce(label_tensor, feature_a, feature_b=None, *, temperature=TEMPERATURE,
            tm=None, tn=None):
    """Pallas implementation of InfoNCE.forward (affine=False).

    Returns (loss, cos_score).  eps is applied per-norm (clamp each ||x|| at eps),
    matching current torch.nn.functional.cosine_similarity.
    """
    if feature_b is None:
        feature_b = feature_a
    if feature_a.ndim == 2:
        fa, fb = feature_a, feature_b
    elif feature_a.ndim == 3 and feature_b.ndim == 3:
        # PyTorch expand(-1, -1, B) requires the trailing dim to be 1.
        fa, fb = feature_a[..., 0], feature_b[..., 0]
    else:
        raise RuntimeError("feature tensors must be rank 2 or 3")

    B, D = fa.shape
    assert fb.shape == (B, D), "feature_a / feature_b shape mismatch"
    cos_dtype = jnp.promote_types(fa.dtype, fb.dtype)
    inv_temperature = float(1.0 / temperature)

    # ---- padding to a legal, tileable batch size ---------------------------------
    Bp = _round_up(B, 8)
    if Bp > 512:                       # large batches: keep the key axis 128-tileable
        Bp = _round_up(B, 128)
    padded = Bp != B

    lab = label_tensor.reshape(B).astype(jnp.int32)
    if padded:
        pad_n = Bp - B
        fa_p = jnp.pad(fa, ((0, pad_n), (0, 0)))
        fb_p = jnp.pad(fb, ((0, pad_n), (0, 0)))
        lab_p = jnp.pad(lab, (0, pad_n))
        col_bias = jnp.concatenate(
            [jnp.zeros((B,), jnp.float32),
             jnp.full((pad_n,), -1e30, jnp.float32)]).reshape(1, Bp)
    else:
        fa_p, fb_p, lab_p = fa, fb, lab
        col_bias = jnp.zeros((1, Bp), jnp.float32)

    lab_row = lab_p.reshape(Bp, 1)     # tiny; block index constant over j
    lab_col = lab_p.reshape(1, Bp)     # lane-dense column labels

    # ---- inverse norms precomputed once (kernel never recomputes them) -----------
    fa32 = fa_p.astype(jnp.float32)
    fb32 = fb_p.astype(jnp.float32)
    inv_na = 1.0 / jnp.maximum(
        jnp.sqrt(jnp.sum(fa32 * fa32, axis=1, keepdims=True)), EPS)       # (Bp, 1)
    inv_nb = (1.0 / jnp.maximum(
        jnp.sqrt(jnp.sum(fb32 * fb32, axis=1)), EPS)).reshape(1, Bp)      # (1, Bp)

    feat_bytes = jnp.dtype(fa.dtype).itemsize
    cos_item = jnp.dtype(cos_dtype).itemsize

    def _block_bytes(tm_, tn_):
        # double-buffered feature/cos blocks + f32 score-tile temporaries + O(row) vectors
        return (2 * (tm_ + tn_) * D * feat_bytes
                + 2 * tm_ * tn_ * cos_item
                + 6 * tm_ * tn_ * 4
                + 8 * (tm_ + tn_) * 4)

    # ---- generation-aware tile / VMEM budgets -------------------------------------
    vmem_cap = _vmem_capacity_bytes()
    small_vmem = vmem_cap <= 80 * _MIB          # v7x-class: 64 MiB per TensorCore
    budget = 24 * _MIB if small_vmem else 56 * _MIB
    limit_cap = 48 * _MIB if small_vmem else 112 * _MIB

    tm_target = 256 if tm is None else int(tm)
    tn_target = 256 if tn is None else int(tn)
    if tm is None and (not small_vmem) and D * feat_bytes >= 1024:
        tm_target = 512          # big-VMEM chips: larger TM halves feature_b re-streaming
    if tm is None and small_vmem and Bp >= 16:
        # v7x: only the "parallel" i axis shards across the 2 TensorCores -> >=2 i tiles
        tm_target = min(tm_target, max(8, (Bp // 2) // 8 * 8))

    while _block_bytes(tm_target, tn_target) > budget and tn_target > 128:
        tn_target //= 2
    while _block_bytes(tm_target, tn_target) > budget and tm_target > 8:
        tm_target //= 2

    TM = _pick_tile(Bp, tm_target, 8)       # sublane-aligned query tile
    TN = _pick_tile(Bp, tn_target, 128)     # lane-aligned key tile (lane-dense stores)
    while _block_bytes(TM, TN) > budget and TM > 8:   # safety if TN fell back to full Bp
        new_tm = _pick_tile(Bp, max(8, TM // 2), 8)
        if new_tm == TM:
            break
        TM = new_tm

    grid = (Bp // TM, Bp // TN)
    vmem_limit = int(min(max(2 * _block_bytes(TM, TN), 32 * _MIB), limit_cap))

    kernel = functools.partial(_infonce_kernel,
                               inv_temperature=inv_temperature,
                               use_col_bias=padded)

    cos, row_loss = pl.pallas_call(
        kernel,
        grid=grid,
        in_specs=[
            pl.BlockSpec((TM, 1), lambda i, j: (i, 0)),    # row labels
            pl.BlockSpec((1, TN), lambda i, j: (0, j)),    # col labels (lane dense)
            pl.BlockSpec((TM, 1), lambda i, j: (i, 0)),    # 1/||a_i||
            pl.BlockSpec((1, TN), lambda i, j: (0, j)),    # 1/||b_j||
            pl.BlockSpec((1, TN), lambda i, j: (0, j)),    # padded-column bias
            pl.BlockSpec((TM, D), lambda i, j: (i, 0)),    # A tile: resident across j
            pl.BlockSpec((TN, D), lambda i, j: (j, 0)),    # B tile: streamed along j
        ],
        out_specs=(
            pl.BlockSpec((TM, TN), lambda i, j: (i, j)),   # cos score tile (written once)
            pl.BlockSpec((TM, 1), lambda i, j: (i, 0)),    # per-row loss (written at j==last)
        ),
        out_shape=(
            jax.ShapeDtypeStruct((Bp, Bp), cos_dtype),
            jax.ShapeDtypeStruct((Bp, 1), jnp.float32),
        ),
        scratch_shapes=[
            pltpu.VMEM((TM, 1), jnp.float32),   # numerator accumulator
            pltpu.VMEM((TM, 1), jnp.float32),   # denominator accumulator
        ],
        compiler_params=pltpu.CompilerParams(
            dimension_semantics=("parallel", "arbitrary"),
            vmem_limit_bytes=vmem_limit,
        ),
        cost_estimate=pl.CostEstimate(
            flops=2 * Bp * Bp * D + 8 * Bp * Bp,
            transcendentals=Bp * Bp + 4 * Bp,
            bytes_accessed=(Bp * D * feat_bytes                 # feature_a (once per i)
                            + grid[0] * Bp * D * feat_bytes     # feature_b re-streamed
                            + Bp * Bp * cos_item                # cos write-back
                            + 16 * Bp),
        ),
    )(lab_row, lab_col, inv_na, inv_nb, col_bias, fa_p, fb_p)

    loss = jnp.mean(row_loss[:B, 0])    # tiny O(B) reduce outside keeps i fully parallel
    if padded:
        cos = cos[:B, :B]
    return loss, cos


def _reference(label, fa, fb, temperature=TEMPERATURE):
    fa = fa.astype(jnp.float32)
    fb = fb.astype(jnp.float32)
    na = jnp.maximum(jnp.linalg.norm(fa, axis=1, keepdims=True), EPS)
    nb = jnp.maximum(jnp.linalg.norm(fb, axis=1, keepdims=True), EPS)
    cos = (fa / na) @ (fb / nb).T
    e = jnp.exp(cos / temperature)
    mask = label[:, None] == label[None, :]
    num = jnp.sum(jnp.where(mask, e, 0.0), axis=1)
    den = jnp.sum(e, axis=1)
    num = jnp.where(num == 0.0, 1.0, num)
    return jnp.mean(-jnp.log(num / den)), cos


if __name__ == "__main__":
    key = jax.random.PRNGKey(0)

    # Case 1: tiny module-scale shapes (single tile), cross- and same-modality paths.
    B, D = 8, 32
    k_a, k_b, k_rest = jax.random.split(key, 3)
    feature_a = jax.random.normal(k_a, (B, D), dtype=jnp.float32)
    feature_b = jax.random.normal(k_b, (B, D), dtype=jnp.float32)
    labels = jnp.array([0, 1, 0, 1, 2, 2, 3, 0], dtype=jnp.int32)

    loss, cos_score = infonce(labels, feature_a, feature_b)
    jax.block_until_ready((loss, cos_score))
    ref_loss, ref_cos = _reference(labels, feature_a, feature_b)
    assert jnp.allclose(cos_score, ref_cos, atol=1e-4), "cos_score mismatch (cross)"
    assert jnp.allclose(loss, ref_loss, atol=1e-4), "loss mismatch (cross)"

    loss_same, cos_same = infonce(labels, feature_a)          # feature_b=None path
    jax.block_until_ready((loss_same, cos_same))
    ref_loss_s, ref_cos_s = _reference(labels, feature_a, feature_a)
    assert jnp.allclose(cos_same, ref_cos_s, atol=1e-4), "cos_score mismatch (same)"
    assert jnp.allclose(loss_same, ref_loss_s, atol=1e-4), "loss mismatch (same)"

    # 3-D (B, D, 1) input path (matches the module's unsqueeze convention).
    loss_3d, cos_3d = infonce(labels, feature_a[:, :, None], feature_b[:, :, None])
    jax.block_until_ready((loss_3d, cos_3d))
    assert jnp.allclose(cos_3d, ref_cos, atol=1e-4), "cos_score mismatch (3d)"

    # Case 2: exercise the tiled path (multiple i tiles and j accumulation tiles).
    B2, D2 = 256, 32
    k_a2, k_b2, k_l2, k_rest2 = jax.random.split(k_rest, 4)
    fa2 = jax.random.normal(k_a2, (B2, D2), dtype=jnp.float32)
    fb2 = jax.random.normal(k_b2, (B2, D2), dtype=jnp.float32)
    lab2 = jax.random.randint(k_l2, (B2,), 0, 4, dtype=jnp.int32)

    loss2, cos2 = infonce(lab2, fa2, fb2, tm=64, tn=128)      # grid = (4, 2)
    jax.block_until_ready((loss2, cos2))
    ref_loss2, ref_cos2 = _reference(lab2, fa2, fb2)
    assert jnp.allclose(cos2, ref_cos2, atol=1e-4), "cos_score mismatch (tiled)"
    assert jnp.allclose(loss2, ref_loss2, atol=1e-3), "loss mismatch (tiled)"

    # Case 3: non-aligned batch (B=12 -> padded to 16, biased padded key columns).
    B3, D3 = 12, 32
    k_a3, k_b3, k_l3 = jax.random.split(k_rest2, 3)
    fa3 = jax.random.normal(k_a3, (B3, D3), dtype=jnp.float32)
    fb3 = jax.random.normal(k_b3, (B3, D3), dtype=jnp.float32)
    lab3 = jax.random.randint(k_l3, (B3,), 0, 3, dtype=jnp.int32)

    loss3, cos3 = infonce(lab3, fa3, fb3)
    jax.block_until_ready((loss3, cos3))
    ref_loss3, ref_cos3 = _reference(lab3, fa3, fb3)
    assert cos3.shape == (B3, B3), "padded cos_score shape mismatch"
    assert jnp.allclose(cos3, ref_cos3, atol=1e-4), "cos_score mismatch (padded)"
    assert jnp.allclose(loss3, ref_loss3, atol=1e-4), "loss mismatch (padded)"

    print("KERNEL_OK")
</pallas_src>

<mosaic_0001>
module attributes {stable_mosaic.version = 11 : i64} {
  func.func @_infonce_kernel(%arg0: i32, %arg1: i32, %arg2: memref<8x1xi32, #tpu.memory_space<vmem>>, %arg3: memref<1x8xi32, #tpu.memory_space<vmem>>, %arg4: memref<8x1xf32, #tpu.memory_space<vmem>>, %arg5: memref<1x8xf32, #tpu.memory_space<vmem>>, %arg6: memref<1x8xf32, #tpu.memory_space<vmem>>, %arg7: memref<8x32xf32, #tpu.memory_space<vmem>>, %arg8: memref<8x32xf32, #tpu.memory_space<vmem>>, %arg9: memref<8x8xf32, #tpu.memory_space<vmem>>, %arg10: memref<8x1xf32, #tpu.memory_space<vmem>>, %arg11: memref<8x1xf32, #tpu.memory_space<vmem>>, %arg12: memref<8x1xf32, #tpu.memory_space<vmem>>) attributes {dimension_semantics = [#tpu.dimension_semantics<parallel>, #tpu.dimension_semantics<arbitrary>], iteration_bounds = array<i64: 1, 1>, scalar_prefetch = 0 : i64, scratch_operands = 2 : i64, tpu.core_type = #tpu.core_type<tc>, window_params = [{transform_indices = @transform_0, window_bounds = array<i64: 8, 1>}, {transform_indices = @transform_1, window_bounds = array<i64: 1, 8>}, {transform_indices = @transform_2, window_bounds = array<i64: 8, 1>}, {transform_indices = @transform_3, window_bounds = array<i64: 1, 8>}, {transform_indices = @transform_4, window_bounds = array<i64: 1, 8>}, {transform_indices = @transform_5, window_bounds = array<i64: 8, 32>}, {transform_indices = @transform_6, window_bounds = array<i64: 8, 32>}, {transform_indices = @transform_7, window_bounds = array<i64: 8, 8>}, {transform_indices = @transform_8, window_bounds = array<i64: 8, 1>}]} {
    %c0_i32 = arith.constant 0 : i32
    %0 = arith.cmpi eq, %arg1, %c0_i32 : i32
    %1 = arith.extui %0 : i1 to i32
    %c0_i32_0 = arith.constant 0 : i32
    %2 = arith.cmpi ne, %1, %c0_i32_0 : i32
    scf.if %2 {
      %cst_29 = arith.constant 0.000000e+00 : f32
      %38 = vector.broadcast %cst_29 : f32 to vector<8x1xf32>
      %c0_30 = arith.constant 0 : index
      %c0_31 = arith.constant 0 : index
      %39 = vector.load %arg11[%c0_30, %c0_31] : memref<8x1xf32, #tpu.memory_space<vmem>>, vector<8x1xf32>
      tpu.vector_store %arg11[%c0_30, %c0_31], %38 {strides = array<i32>} : memref<8x1xf32, #tpu.memory_space<vmem>>, vector<8x1xf32>,
      %cst_32 = arith.constant 0.000000e+00 : f32
      %40 = vector.broadcast %cst_32 : f32 to vector<8x1xf32>
      %c0_33 = arith.constant 0 : index
      %c0_34 = arith.constant 0 : index
      %41 = vector.load %arg12[%c0_33, %c0_34] : memref<8x1xf32, #tpu.memory_space<vmem>>, vector<8x1xf32>
      tpu.vector_store %arg12[%c0_33, %c0_34], %40 {strides = array<i32>} : memref<8x1xf32, #tpu.memory_space<vmem>>, vector<8x1xf32>,
    } else {
    }
    %c0 = arith.constant 0 : index
    %c0_1 = arith.constant 0 : index
    %3 = vector.load %arg7[%c0, %c0_1] : memref<8x32xf32, #tpu.memory_space<vmem>>, vector<8x32xf32>
    %c0_2 = arith.constant 0 : index
    %c0_3 = arith.constant 0 : index
    %4 = vector.load %arg8[%c0_2, %c0_3] : memref<8x32xf32, #tpu.memory_space<vmem>>, vector<8x32xf32>
    %cst = arith.constant dense<0.000000e+00> : vector<8x8xf32>
    %5 = tpu.matmul %3, %4, %cst {dimension_numbers = #tpu.dot_dimension_numbers<[1], [1], [0], [0], [0, 0, 1, 0], [], []>} : vector<8x32xf32>, vector<8x32xf32>, vector<8x8xf32> -> vector<8x8xf32>
    %c0_4 = arith.constant 0 : index
    %c0_5 = arith.constant 0 : index
    %6 = vector.load %arg4[%c0_4, %c0_5] : memref<8x1xf32, #tpu.memory_space<vmem>>, vector<8x1xf32>
    %c0_6 = arith.constant 0 : index
    %c0_7 = arith.constant 0 : index
    %7 = vector.load %arg5[%c0_6, %c0_7] : memref<1x8xf32, #tpu.memory_space<vmem>>, vector<1x8xf32>
    %8 = vector.broadcast %6 : vector<8x1xf32> to vector<8x8xf32>
    %9 = arith.mulf %5, %8 : vector<8x8xf32>
    %10 = vector.broadcast %7 : vector<1x8xf32> to vector<8x8xf32>
    %11 = arith.mulf %9, %10 : vector<8x8xf32>
    %c0_8 = arith.constant 0 : index
    %c0_9 = arith.constant 0 : index
    %12 = vector.load %arg9[%c0_8, %c0_9] : memref<8x8xf32, #tpu.memory_space<vmem>>, vector<8x8xf32>
    tpu.vector_store %arg9[%c0_8, %c0_9], %11 {strides = array<i32>} : memref<8x8xf32, #tpu.memory_space<vmem>>, vector<8x8xf32>,
    %cst_10 = arith.constant 14.2857141 : f32
    %13 = vector.broadcast %cst_10 : f32 to vector<1x8xf32>
    %14 = arith.mulf %7, %13 : vector<1x8xf32>
    %15 = vector.broadcast %14 : vector<1x8xf32> to vector<8x8xf32>
    %16 = arith.mulf %9, %15 : vector<8x8xf32>
    %17 = math.exp %16 : vector<8x8xf32>
    %c0_11 = arith.constant 0 : index
    %c0_12 = arith.constant 0 : index
    %18 = vector.load %arg2[%c0_11, %c0_12] : memref<8x1xi32, #tpu.memory_space<vmem>>, vector<8x1xi32>
    %c0_13 = arith.constant 0 : index
    %c0_14 = arith.constant 0 : index
    %19 = vector.load %arg3[%c0_13, %c0_14] : memref<1x8xi32, #tpu.memory_space<vmem>>, vector<1x8xi32>
    %20 = vector.broadcast %18 : vector<8x1xi32> to vector<8x8xi32>
    %21 = vector.broadcast %19 : vector<1x8xi32> to vector<8x8xi32>
    %22 = arith.cmpi eq, %20, %21 : vector<8x8xi32>
    %c0_15 = arith.constant 0 : index
    %c0_16 = arith.constant 0 : index
    %23 = vector.load %arg11[%c0_15, %c0_16] : memref<8x1xf32, #tpu.memory_space<vmem>>, vector<8x1xf32>
    %cst_17 = arith.constant 0.000000e+00 : f32
    %24 = vector.broadcast %cst_17 : f32 to vector<8x8xf32>
    %25 = arith.select %22, %17, %24 : vector<8x8xi1>, vector<8x8xf32>
    %cst_18 = arith.constant dense<0.000000e+00> : vector<8xf32>
    %26 = vector.multi_reduction <add>, %25, %cst_18 [1] : vector<8x8xf32> to vector<8xf32>
    %27 = vector.shape_cast %26 : vector<8xf32> to vector<8x1xf32>
    %28 = arith.addf %23, %27 : vector<8x1xf32>
    %c0_19 = arith.constant 0 : index
    %c0_20 = arith.constant 0 : index
    %29 = vector.load %arg11[%c0_19, %c0_20] : memref<8x1xf32, #tpu.memory_space<vmem>>, vector<8x1xf32>
    tpu.vector_store %arg11[%c0_19, %c0_20], %28 {strides = array<i32>} : memref<8x1xf32, #tpu.memory_space<vmem>>, vector<8x1xf32>,
    %cst_21 = arith.constant 1.000000e+00 : f32
    %30 = vector.broadcast %cst_21 : f32 to vector<8x1xf32>
    %c0_22 = arith.constant 0 : index
    %c0_23 = arith.constant 0 : index
    %31 = vector.load %arg12[%c0_22, %c0_23] : memref<8x1xf32, #tpu.memory_space<vmem>>, vector<8x1xf32>
    %cst_24 = arith.constant dense<0.000000e+00> : vector<8x1xf32>
    %32 = tpu.matmul %17, %30, %cst_24 {dimension_numbers = #tpu.dot_dimension_numbers<[1], [0], [0], [1], [0, 0, 1, 1], [], []>} : vector<8x8xf32>, vector<8x1xf32>, vector<8x1xf32> -> vector<8x1xf32>
    %33 = arith.addf %31, %32 : vector<8x1xf32>
    %c0_25 = arith.constant 0 : index
    %c0_26 = arith.constant 0 : index
    %34 = vector.load %arg12[%c0_25, %c0_26] : memref<8x1xf32, #tpu.memory_space<vmem>>, vector<8x1xf32>
    tpu.vector_store %arg12[%c0_25, %c0_26], %33 {strides = array<i32>} : memref<8x1xf32, #tpu.memory_space<vmem>>, vector<8x1xf32>,
    %c0_i32_27 = arith.constant 0 : i32
    %35 = arith.cmpi eq, %arg1, %c0_i32_27 : i32
    %36 = arith.extui %35 : i1 to i32
    %c0_i32_28 = arith.constant 0 : i32
    %37 = arith.cmpi ne, %36, %c0_i32_28 : i32
    scf.if %37 {
      %c0_29 = arith.constant 0 : index
      %c0_30 = arith.constant 0 : index
      %38 = vector.load %arg11[%c0_29, %c0_30] : memref<8x1xf32, #tpu.memory_space<vmem>>, vector<8x1xf32>
      %c0_31 = arith.constant 0 : index
      %c0_32 = arith.constant 0 : index
      %39 = vector.load %arg12[%c0_31, %c0_32] : memref<8x1xf32, #tpu.memory_space<vmem>>, vector<8x1xf32>
      %cst_33 = arith.constant 0.000000e+00 : f32
      %40 = vector.broadcast %cst_33 : f32 to vector<8x1xf32>
      %41 = arith.cmpf oeq, %38, %40 : vector<8x1xf32>
      %cst_34 = arith.constant 1.000000e+00 : f32
      %42 = vector.broadcast %cst_34 : f32 to vector<8x1xf32>
      %43 = arith.select %41, %42, %38 : vector<8x1xi1>, vector<8x1xf32>
      %44 = math.log %39 : vector<8x1xf32>
      %45 = math.log %43 : vector<8x1xf32>
      %46 = arith.subf %44, %45 : vector<8x1xf32>
      %c0_35 = arith.constant 0 : index
      %c0_36 = arith.constant 0 : index
      %47 = vector.load %arg10[%c0_35, %c0_36] : memref<8x1xf32, #tpu.memory_space<vmem>>, vector<8x1xf32>
      tpu.vector_store %arg10[%c0_35, %c0_36], %46 {strides = array<i32>} : memref<8x1xf32, #tpu.memory_space<vmem>>, vector<8x1xf32>,
    } else {
    }
    return
  }
  func.func @transform_0(%arg0: i32, %arg1: i32) -> (i32, i32) {
    %c0_i32 = arith.constant 0 : i32
    %c0_i32_0 = arith.constant 0 : i32
    return %arg0, %c0_i32 : i32, i32
  }
  func.func @transform_1(%arg0: i32, %arg1: i32) -> (i32, i32) {
    %c0_i32 = arith.constant 0 : i32
    %c0_i32_0 = arith.constant 0 : i32
    return %c0_i32, %arg1 : i32, i32
  }
  func.func @transform_2(%arg0: i32, %arg1: i32) -> (i32, i32) {
    %c0_i32 = arith.constant 0 : i32
    %c0_i32_0 = arith.constant 0 : i32
    return %arg0, %c0_i32 : i32, i32
  }
  func.func @transform_3(%arg0: i32, %arg1: i32) -> (i32, i32) {
    %c0_i32 = arith.constant 0 : i32
    %c0_i32_0 = arith.constant 0 : i32
    return %c0_i32, %arg1 : i32, i32
  }
  func.func @transform_4(%arg0: i32, %arg1: i32) -> (i32, i32) {
    %c0_i32 = arith.constant 0 : i32
    %c0_i32_0 = arith.constant 0 : i32
    return %c0_i32, %arg1 : i32, i32
  }
  func.func @transform_5(%arg0: i32, %arg1: i32) -> (i32, i32) {
    %c0_i32 = arith.constant 0 : i32
    %c0_i32_0 = arith.constant 0 : i32
    return %arg0, %c0_i32 : i32, i32
  }
  func.func @transform_6(%arg0: i32, %arg1: i32) -> (i32, i32) {
    %c0_i32 = arith.constant 0 : i32
    %c0_i32_0 = arith.constant 0 : i32
    return %arg1, %c0_i32 : i32, i32
  }
  func.func @transform_7(%arg0: i32, %arg1: i32) -> (i32, i32) {
    %c0_i32 = arith.constant 0 : i32
    return %arg0, %arg1 : i32, i32
  }
  func.func @transform_8(%arg0: i32, %arg1: i32) -> (i32, i32) {
    %c0_i32 = arith.constant 0 : i32
    %c0_i32_0 = arith.constant 0 : i32
    return %arg0, %c0_i32 : i32, i32
  }
}

</mosaic_0001>

<bundles_post_ra>
// kernel: tpu_custom_call.1
= control target key start
LH: loop header
LB: loop body
LE: loop exit
PB: predicated region body
PF: predicated region fallthrough
CT: control target
= control target key end

     0   :  { %vm38_vm0 = vcmask 261120   ;;  %v319_v1 = vmov 0.0   ;;  %vm320_vm1 = vmmov 0   ;;  %v321_v4 = vmov 0   ;;  %s398_s0 = inlined_call_operand.vmem [shape: s32[8,1], index: 0, kind: input, shape index: {}]   ;;  %s399_s1 = inlined_call_operand.vmem [shape: s32[1,8], index: 1, kind: input, shape index: {}]   ;;  %s400_s2 = inlined_call_operand.vmem [shape: f32[8,1], index: 2, kind: input, shape index: {}]   ;;  %s401_s3 = inlined_call_operand.vmem [shape: f32[1,8], index: 3, kind: input, shape index: {}]   ;;  %s402_s4 = inlined_call_operand.vmem [shape: f32[1,8], index: 4, kind: input, shape index: {}]   ;;  %s403_s5 = inlined_call_operand.vmem [shape: f32[8,32], index: 5, kind: input, shape index: {}]   ;;  %s404_s6 = inlined_call_operand.vmem [shape: f32[8,32], index: 6, kind: input, shape index: {}]   ;;  %s405_s7 = inlined_call_operand.hbm [shape: f32[8,8], index: 7, kind: output, shape index: {0}]   ;;  %s406_s8 = inlined_call_operand.vmem [shape: f32[8,1], index: 8, kind: output, shape index: {1}]  }
   0x1   :  { %v37_v0 = vld [vmem:[%s404_s6] sm:$0xff]  ;;  %275 = vmatprep.subr.mxu0 %v319_v1  ;;  %277 = vmatprep.mubr.msk.f32.mxu0 %vm320_vm1, %v319_v1 }
   0x2   :  { %v115_v2 = vld [vmem:[%s400_s2] sm:$0xff]  ;;  %276 = vmatpush3.xpose.msk.msra.mxu0 %vm38_vm0, %v37_v0  ;;  %290 = vset.pattern.permute.xlu0 %v321_v4 }
   0x3   :  { %v36_v3 = vld [vmem:[%s403_s5] sm:$0xff] }
   0x4   :  { %14 = vsyncpa [#allocation5], 0  ;;  %119 = vperm.xlu0 %290, %v115_v2   ;;  %280 = vmatprep.subr.mxu1 %v319_v1  ;;  %v142_v5 = vld [vmem:[%s398_s0] sm:$0xff]  ;;  %v322_v6 = vmov 1.0   ;;  %v124_v7 = vlaneseq  ;;  %vm130_vm2 = vcmask 64512   ;;  %vm33_vm4 = vcmask 7168  }
   0x5   :  { %282 = vmatprep.mubr.msk.f32.mxu1 %vm320_vm1, %v319_v1  ;;  %278 = vmatmul.mubr.msk.f32.vlgmr.msra.gmra.mxu0 %vm38_vm0, %v36_v3  ;;  %v116_v9 = vld [vmem:[%s401_s3] sm:$0x1]  ;;  %34 = vst.msk [vmem:[#allocation2] sm:$0xff] %vm33_vm4, %v319_v1  ;;  %35 = vst.msk [vmem:[#allocation3] sm:$0xff] %vm33_vm4, %v319_v1  ;;  %s323_s3 = smov [#allocation4]  }
   0x6   :  { %281 = vmatpush3.msra.mxu1 %v322_v6  ;;  %v125_v8 = vshrl.u32 %v124_v7, 7  ;;  %v132_v11 = vmul.f32 14.285714, %v116_v9  ;;  %v269_v21 = vld [vmem:[%s399_s1] ss:$0 sm:$0xff]  ;;  %s255_s12 = sshll.u32 %s323_s3, 4  ;;  %s256_s12 = int_to_ptr.vmem [resolvable:$true] %s255_s12 }
   0x7   :  { %s297_s13 = scalar_lea.vmem %s256_s12, 128  ;;  %p302_p1 = scmp.lt.s32.totalorder %s256_s12, %s256_s12 }
   0x8   :  { %145 = vperm.xlu0 %290, %v142_v5   ;;  %v126_v10 = vsub.s32 0, %v125_v8  ;;  %p298_p0 = scmp.ne.s32.totalorder %s256_s12, %s297_s13  ;;  %p303_p2 = scmp.lt.s32.totalorder %s297_s13, %s297_s13 }
   0xa   :  { %v127_v12 = vrot.slane %v116_v9, %v126_v10  ;;  %v137_v13 = vrot.slane %v132_v11, %v126_v10  ;;  %p304_p3 = por %p303_p2, %p302_p1 }
   0xc   :  { %p305_p4 = pnand %p304_p3, %p298_p0 }
  0x7f   :  { %v120_v14 = vpop.permute.xlu0 %119 }
  0x83   :  { %v146_v22 = vpop.permute.xlu0 %145 }
  0x84   :  { %vm151_vm3 = vcmp.eq.s32.totalorder %v146_v22, %v269_v21 }
  0xc5   :  { %v111_v15 = vpop.f32.mrf.mxu0 }
  0xc6   :  { %v122_v16 = vmul.f32 %v120_v14, %v111_v15 }
  0xc7   :  { %v279_v17 = vpop.f32.mrf.mxu0 }
  0xc8   :  { %v129_v18 = vmul.f32 %v127_v12, %v122_v16  ;;  %v139_v19 = vmul.f32 %v137_v13, %v122_v16 }
  0xca   :  { %v140_v20 = vmul.f32 1.442695, %v139_v19  ;;  %131 = vst.msk [vmem:[#allocation4] sm:$0xff] %vm130_vm2, %v129_v18 }
  0xcc   :  { %291 = vpow2.f32 %v140_v20 }
  0xd9   :  { %v292_v23 = vpop.eup %291 }
  0xda   :  { %283 = vmatmul.mubr.msk.f32.vlgmr.msra.gmra.mxu1 %vm130_vm2, %v292_v23  ;;  %v153_v24 = vsel %vm151_vm3, %v292_v23, 0.0 }
  0xdb   :  { %v154_v25 = vsel %vm130_vm2, %v153_v24, 0.0 }
  0xdc   :  { %155 = vadd.xlane.f32.xlu1 %v154_v25 }
  0xdd   :  { %308 = shalt.err (!%p305_p4)
}
  0xde   :  { %258 = dma.vmem_to_hbm [thread:$0]  %s256_s12, 128, %s405_s7, [#allocation5]   ;;  %v152_v26 = vld [vmem:[#allocation2] sm:$0xff]  ;;  %v160_v29 = vld [vmem:[#allocation3] sm:$0xff] }
 0x165   :  { %v156_v27 = vpop.xlane.xlu1 %155 }
 0x166   :  { %v157_v28 = vadd.f32 %v156_v27, %v152_v26 }
 0x168   :  { %159 = vst.msk [vmem:[#allocation2] sm:$0xff] %vm33_vm4, %v157_v28 }
 0x16f   :  { %v239_v30 = vld [vmem:[#allocation2] sm:$0xff] }
 0x170   :  { %vm241_vm5 = vcmp.eq.f32.partialorder %v239_v30, 0.0 }
 0x171   :  { %v242_v34 = vsel %vm241_vm5, 1.0, %v239_v30 }
 0x172   :  { %293 = vlog2.f32 %v242_v34 }
 0x17f   :  { %v294_v36 = vpop.eup %293 }
 0x180   :  { %v246_v38 = vmul.f32 0.6931472, %v294_v36 }
 0x19a   :  { %v230_v31 = vpop.f32.mrf.mxu1 }
 0x19b   :  { %v234_v32 = vadd.f32 %v230_v31, %v160_v29 }
 0x19c   :  { %v284_v33 = vpop.f32.mrf.mxu1 }
 0x19d   :  { %235 = vst.msk [vmem:[#allocation3] sm:$0xff] %vm33_vm4, %v234_v32 }
 0x1a4   :  { %v240_v35 = vld [vmem:[#allocation3] sm:$0xff] }
 0x1a5   :  { %295 = vlog2.f32 %v240_v35 }
 0x1b2   :  { %v296_v37 = vpop.eup %295 }
 0x1b3   :  { %v244_v39 = vmul.f32 0.6931472, %v296_v37 }
 0x1b5   :  { %v247_v40 = vsub.f32 %v244_v39, %v246_v38 }
 0x1b7   :  { %248 = vst.msk [vmem:[%s406_s8] sm:$0xff] %vm33_vm4, %v247_v40 }
 0x1b8   :  { %317 = dma.done.wait [#allocation5], 128  }
 0x1b9   :  { %318 = vsyncadd [#allocation5], 4294967168 }
 0x1ba   :  { %266 = vsyncpa [#allocation5], 1 }

</bundles_post_ra>
